<compile_context>
chip_gen: v6e
topology: v6e:2x2x1
jax: 0.10.0
libtpu: 0.0.40
codegen_flags: <defaults>
</compile_context>

<pallas_src>
import functools
import math

import numpy as np
import jax
import jax.numpy as jnp
from jax.experimental import pallas as pl
from jax.experimental.pallas import tpu as pltpu


def _round_up(x, m):
    return ((x + m - 1) // m) * m


def _act(h, activation):
    if activation == "relu":
        return jnp.maximum(h, 0.0)
    # tanh-approx GELU (EUP tanh slot); matches jax.nn.gelu(approximate=True).
    # TODO(synk): PyTorch F.gelu defaults to the exact erf form (diff ~1e-3).
    c = math.sqrt(2.0 / math.pi)
    return 0.5 * h * (1.0 + jnp.tanh(c * (h + 0.044715 * h * h * h)))


# ----------------------------------------------------------------------------
# NCL-native kernel: one (batch, position-tile) block per grid step.
#   out[:, co, p] = W2 @ act(W1 @ x + b1) + Ws @ x + (b2 + bs)
# ----------------------------------------------------------------------------
def _mlp_res_ncl_kernel(x_ref, wpack_ref, b1_ref, w2_ref, bout_ref, o_ref,
                        *, hidden_dim, activation):
    # x_ref:  (1, Cin, tn)            activation tile (NCL orientation)
    # wpack:  (H+Cout, Cin)   bf16    [W1 ; Wshortcut] stacked on output channels
    # b1:     (H, 1)          f32
    # w2:     (Cout, H)       bf16
    # bout:   (Cout, 1)       f32     b2 + bs folded host-side
    xb = x_ref[0].astype(jnp.bfloat16)                               # (Cin, tn)
    hs = jnp.dot(wpack_ref[...], xb,
                 preferred_element_type=jnp.float32)                 # (H+Cout, tn) f32
    h = _act(hs[:hidden_dim] + b1_ref[...], activation)              # f32 elementwise
    sc = hs[hidden_dim:]                                             # shortcut (Cout, tn)
    out = jnp.dot(w2_ref[...], h.astype(jnp.bfloat16),
                  preferred_element_type=jnp.float32)
    o_ref[0] = (out + sc + bout_ref[...]).astype(o_ref.dtype)


# ----------------------------------------------------------------------------
# Row-folded fallback kernel (small n): rows = B*n positions, lanes = channels.
# ----------------------------------------------------------------------------
def _mlp_res_rows_kernel(x_ref, wpack_ref, b1_ref, w2_ref, bout_ref, o_ref,
                         *, hidden_dim, activation):
    # x_ref: (tm, Cin); wpack: (Cin, H+Cout) bf16; b1: (1, H) f32;
    # w2: (H, Cout) bf16; bout: (1, Cout) f32
    xb = x_ref[...].astype(jnp.bfloat16)
    hs = jnp.dot(xb, wpack_ref[...], preferred_element_type=jnp.float32)  # (tm, H+Cout)
    h = _act(hs[:, :hidden_dim] + b1_ref[...], activation)
    sc = hs[:, hidden_dim:]
    out = jnp.dot(h.astype(jnp.bfloat16), w2_ref[...],
                  preferred_element_type=jnp.float32)
    o_ref[...] = (out + sc + bout_ref[...]).astype(o_ref.dtype)


# ----------------------------------------------------------------------------
# Wrapper
# ----------------------------------------------------------------------------
def mlp_res_forward(x, params, activation="relu", tn=512, tm=512):
    """Fused MLP_Res forward.  x: (B, Cin, n) -> (B, Cout, n).

    params use PyTorch Conv1d orientation: w1 (H, Cin), w2 (Cout, H),
    ws (Cout, Cin), biases 1-D per output channel.
    """
    B, Cin, n = x.shape
    H, Cin_w = params["w1"].shape
    Cout = params["w2"].shape[0]
    assert Cin_w == Cin, (Cin_w, Cin)

    # One-time tiny host-side packing (bf16 MXU operands, folded output bias).
    wpack = jnp.concatenate([params["w1"], params["ws"]], axis=0).astype(jnp.bfloat16)
    w2 = params["w2"].astype(jnp.bfloat16)
    b1 = params["b1"].astype(jnp.float32)
    bout = (params["b2"] + params["bs"]).astype(jnp.float32)

    lane_divs = [d for d in range(128, n + 1, 128) if n % d == 0]

    if lane_divs:
        # -------- NCL-native path: no activation transposes at all --------
        cands = [d for d in lane_divs if d <= max(tn, 128)] or [lane_divs[0]]
        tn_eff = max(cands)
        if B * (n // tn_eff) < 2:           # give v7x's 2 TensorCores >= 2 tiles
            two_tile = [d for d in lane_divs if B * (n // d) >= 2]
            if two_tile:
                tn_eff = max(two_tile)
        grid = (B, n // tn_eff)

        # VMEM budget (double-buffered x/out tiles + resident weights), capped
        # at 48 MiB so it always fits v7x's 64 MiB VMEM with headroom.
        isz = jnp.dtype(x.dtype).itemsize
        blk_bytes = (Cin + Cout) * tn_eff * isz
        w_bytes = ((H + Cout) * Cin + Cout * H) * 2 + (H + Cout) * 4
        need = 2 * blk_bytes + 2 * w_bytes + (1 << 20)
        vmem_limit = int(min(need + need // 4, 48 << 20)) if need > (16 << 20) else None

        const = lambda shp: pl.BlockSpec(shp, lambda b, j: (0, 0))
        return pl.pallas_call(
            functools.partial(_mlp_res_ncl_kernel, hidden_dim=H, activation=activation),
            out_shape=jax.ShapeDtypeStruct((B, Cout, n), x.dtype),
            grid_spec=pltpu.PrefetchScalarGridSpec(
                num_scalar_prefetch=0,
                grid=grid,
                in_specs=[
                    pl.BlockSpec((1, Cin, tn_eff), lambda b, j: (b, 0, j)),
                    const((H + Cout, Cin)),   # [W1; Ws]   (VMEM-resident)
                    const((H, 1)),            # b1
                    const((Cout, H)),         # W2
                    const((Cout, 1)),         # b2 + bs
                ],
                out_specs=pl.BlockSpec((1, Cout, tn_eff), lambda b, j: (b, 0, j)),
            ),
            compiler_params=pltpu.CompilerParams(
                dimension_semantics=("parallel", "parallel"),
                vmem_limit_bytes=vmem_limit),
        )(x, wpack, b1.reshape(H, 1), w2, bout.reshape(Cout, 1))

    # -------- Row-folded fallback (n too small / odd for lane-dense NCL) ----
    M = B * n
    X = jnp.transpose(x, (0, 2, 1)).reshape(M, Cin)
    tm_eff = min(tm, _round_up(M, 8))
    if tm_eff >= M and M > 8:               # still try to give megacore 2 tiles
        tm_eff = _round_up((M + 1) // 2, 8)
    Mp = _round_up(M, tm_eff)
    if Mp != M:
        X = jnp.pad(X, ((0, Mp - M), (0, 0)))
    grid = (Mp // tm_eff,)

    const = lambda shp: pl.BlockSpec(shp, lambda i: (0, 0))
    out = pl.pallas_call(
        functools.partial(_mlp_res_rows_kernel, hidden_dim=H, activation=activation),
        out_shape=jax.ShapeDtypeStruct((Mp, Cout), x.dtype),
        grid_spec=pltpu.PrefetchScalarGridSpec(
            num_scalar_prefetch=0,
            grid=grid,
            in_specs=[
                pl.BlockSpec((tm_eff, Cin), lambda i: (i, 0)),
                const((Cin, H + Cout)),       # [W1 | Ws] (channels-last)
                const((1, H)),
                const((H, Cout)),
                const((1, Cout)),
            ],
            out_specs=pl.BlockSpec((tm_eff, Cout), lambda i: (i, 0)),
        ),
        compiler_params=pltpu.CompilerParams(dimension_semantics=("parallel",)),
    )(X, wpack.T, b1.reshape(1, H), w2.T, bout.reshape(1, Cout))
    out = out[:M].reshape(B, n, Cout)
    return jnp.transpose(out, (0, 2, 1))


# ----------------------------------------------------------------------------
# Pure-JAX reference (f32) for the correctness check
# ----------------------------------------------------------------------------
def reference_forward(x, params, activation="relu"):
    h = jnp.einsum("hc,bcn->bhn", params["w1"], x) + params["b1"][None, :, None]
    h = jax.nn.relu(h) if activation == "relu" else jax.nn.gelu(h, approximate=True)
    out = jnp.einsum("oh,bhn->bon", params["w2"], h) + params["b2"][None, :, None]
    sc = jnp.einsum("oc,bcn->bon", params["ws"], x) + params["bs"][None, :, None]
    return out + sc


# ----------------------------------------------------------------------------
# Deterministic parameter init (PyTorch Conv1d orientation: W is (out, in))
# ----------------------------------------------------------------------------
def init_params(key, in_dim, hidden_dim, out_dim):
    keys = iter(jax.random.split(key, 6))
    w = lambda shape, s=0.05: s * jax.random.normal(next(keys), shape, jnp.float32)
    return dict(
        w1=w((hidden_dim, in_dim)), b1=w((hidden_dim,), 0.02),
        w2=w((out_dim, hidden_dim)), b2=w((out_dim,), 0.02),
        ws=w((out_dim, in_dim)), bs=w((out_dim,), 0.02),
    )


if __name__ == "__main__":
    key = jax.random.PRNGKey(0)
    k_param, k_x1, k_x2 = jax.random.split(key, 3)

    in_dim = hidden_dim = out_dim = 128      # MLP_Res defaults
    P = init_params(k_param, in_dim, hidden_dim, out_dim)

    # 1) Main NCL-native path (n multiple of 128): transpose-free, 2-axis grid.
    B, n = 2, 256
    x = jax.random.normal(k_x1, (B, in_dim, n), jnp.float32)
    out = jax.block_until_ready(mlp_res_forward(x, P, activation="relu"))
    ref = reference_forward(x, P, activation="relu")
    assert out.shape == (B, out_dim, n), out.shape
    np.testing.assert_allclose(np.asarray(out), np.asarray(ref), rtol=2e-2, atol=2e-2)

    # 2) Row-folded fallback path (small n), gelu activation.
    B2, n2 = 2, 16
    x2 = jax.random.normal(k_x2, (B2, in_dim, n2), jnp.float32)
    out2 = jax.block_until_ready(mlp_res_forward(x2, P, activation="gelu"))
    ref2 = reference_forward(x2, P, activation="gelu")
    assert out2.shape == (B2, out_dim, n2), out2.shape
    np.testing.assert_allclose(np.asarray(out2), np.asarray(ref2), rtol=2e-2, atol=2e-2)

    print("KERNEL_OK")
</pallas_src>

<mosaic_0001>
module attributes {stable_mosaic.version = 11 : i64} {
  func.func @_mlp_res_ncl_kernel(%arg0: i32, %arg1: i32, %arg2: memref<1x128x256xf32, #tpu.memory_space<vmem>>, %arg3: memref<256x128xbf16, #tpu.memory_space<vmem>>, %arg4: memref<128x1xf32, #tpu.memory_space<vmem>>, %arg5: memref<128x128xbf16, #tpu.memory_space<vmem>>, %arg6: memref<128x1xf32, #tpu.memory_space<vmem>>, %arg7: memref<1x128x256xf32, #tpu.memory_space<vmem>>) attributes {dimension_semantics = [#tpu.dimension_semantics<parallel>, #tpu.dimension_semantics<parallel>], iteration_bounds = array<i64: 2, 1>, scalar_prefetch = 0 : i64, scratch_operands = 0 : i64, tpu.core_type = #tpu.core_type<tc>, window_params = [{transform_indices = @transform_0, window_bounds = array<i64: 1, 128, 256>}, {pipeline_mode = #tpu.pipeline_mode<synchronous>, transform_indices = @transform_1, window_bounds = array<i64: 256, 128>}, {pipeline_mode = #tpu.pipeline_mode<synchronous>, transform_indices = @transform_2, window_bounds = array<i64: 128, 1>}, {pipeline_mode = #tpu.pipeline_mode<synchronous>, transform_indices = @transform_3, window_bounds = array<i64: 128, 128>}, {pipeline_mode = #tpu.pipeline_mode<synchronous>, transform_indices = @transform_4, window_bounds = array<i64: 128, 1>}, {transform_indices = @transform_5, window_bounds = array<i64: 1, 128, 256>}]} {
    %c0 = arith.constant 0 : index
    %c0_0 = arith.constant 0 : index
    %c0_1 = arith.constant 0 : index
    %0 = vector.load %arg2[%c0, %c0_0, %c0_1] : memref<1x128x256xf32, #tpu.memory_space<vmem>>, vector<1x128x256xf32>
    %1 = vector.shape_cast %0 : vector<1x128x256xf32> to vector<128x256xf32>
    %2 = arith.truncf %1 : vector<128x256xf32> to vector<128x256xbf16>
    %c0_2 = arith.constant 0 : index
    %c0_3 = arith.constant 0 : index
    %3 = vector.load %arg3[%c0_2, %c0_3] : memref<256x128xbf16, #tpu.memory_space<vmem>>, vector<256x128xbf16>
    %cst = arith.constant dense<0.000000e+00> : vector<256x256xf32>
    %4 = tpu.matmul %3, %2, %cst {dimension_numbers = #tpu.dot_dimension_numbers<[1], [0], [0], [1], [0, 0, 1, 1], [], []>} : vector<256x128xbf16>, vector<128x256xbf16>, vector<256x256xf32> -> vector<256x256xf32>
    %5 = vector.extract_strided_slice %4 {offsets = [0, 0], sizes = [128, 256], strides = [1, 1]} : vector<256x256xf32> to vector<128x256xf32>
    %c0_4 = arith.constant 0 : index
    %c0_5 = arith.constant 0 : index
    %6 = vector.load %arg4[%c0_4, %c0_5] : memref<128x1xf32, #tpu.memory_space<vmem>>, vector<128x1xf32>
    %7 = vector.broadcast %6 : vector<128x1xf32> to vector<128x256xf32>
    %8 = arith.addf %5, %7 : vector<128x256xf32>
    %cst_6 = arith.constant 0.000000e+00 : f32
    %9 = vector.broadcast %cst_6 : f32 to vector<128x256xf32>
    %10 = arith.maximumf %8, %9 : vector<128x256xf32>
    %11 = vector.extract_strided_slice %4 {offsets = [128, 0], sizes = [128, 256], strides = [1, 1]} : vector<256x256xf32> to vector<128x256xf32>
    %c0_7 = arith.constant 0 : index
    %c0_8 = arith.constant 0 : index
    %12 = vector.load %arg5[%c0_7, %c0_8] : memref<128x128xbf16, #tpu.memory_space<vmem>>, vector<128x128xbf16>
    %13 = arith.truncf %10 : vector<128x256xf32> to vector<128x256xbf16>
    %cst_9 = arith.constant dense<0.000000e+00> : vector<128x256xf32>
    %14 = tpu.matmul %12, %13, %cst_9 {dimension_numbers = #tpu.dot_dimension_numbers<[1], [0], [0], [1], [0, 0, 1, 1], [], []>} : vector<128x128xbf16>, vector<128x256xbf16>, vector<128x256xf32> -> vector<128x256xf32>
    %15 = arith.addf %14, %11 : vector<128x256xf32>
    %c0_10 = arith.constant 0 : index
    %c0_11 = arith.constant 0 : index
    %16 = vector.load %arg6[%c0_10, %c0_11] : memref<128x1xf32, #tpu.memory_space<vmem>>, vector<128x1xf32>
    %17 = vector.broadcast %16 : vector<128x1xf32> to vector<128x256xf32>
    %18 = arith.addf %15, %17 : vector<128x256xf32>
    %c0_12 = arith.constant 0 : index
    %c0_13 = arith.constant 0 : index
    %c0_14 = arith.constant 0 : index
    %19 = vector.load %arg7[%c0_12, %c0_13, %c0_14] : memref<1x128x256xf32, #tpu.memory_space<vmem>>, vector<1x128x256xf32>
    %20 = vector.shape_cast %19 : vector<1x128x256xf32> to vector<128x256xf32>
    %21 = vector.shape_cast %18 : vector<128x256xf32> to vector<1x128x256xf32>
    tpu.vector_store %arg7[%c0_12, %c0_13, %c0_14], %21 {strides = array<i32>} : memref<1x128x256xf32, #tpu.memory_space<vmem>>, vector<1x128x256xf32>,
    return
  }
  func.func @transform_0(%arg0: i32, %arg1: i32) -> (i32, i32, i32) {
    %c0_i32 = arith.constant 0 : i32
    %c0_i32_0 = arith.constant 0 : i32
    return %arg0, %c0_i32, %arg1 : i32, i32, i32
  }
  func.func @transform_1(%arg0: i32, %arg1: i32) -> (i32, i32) {
    %c0_i32 = arith.constant 0 : i32
    %c0_i32_0 = arith.constant 0 : i32
    %c0_i32_1 = arith.constant 0 : i32
    return %c0_i32, %c0_i32_0 : i32, i32
  }
  func.func @transform_2(%arg0: i32, %arg1: i32) -> (i32, i32) {
    %c0_i32 = arith.constant 0 : i32
    %c0_i32_0 = arith.constant 0 : i32
    %c0_i32_1 = arith.constant 0 : i32
    return %c0_i32, %c0_i32_0 : i32, i32
  }
  func.func @transform_3(%arg0: i32, %arg1: i32) -> (i32, i32) {
    %c0_i32 = arith.constant 0 : i32
    %c0_i32_0 = arith.constant 0 : i32
    %c0_i32_1 = arith.constant 0 : i32
    return %c0_i32, %c0_i32_0 : i32, i32
  }
  func.func @transform_4(%arg0: i32, %arg1: i32) -> (i32, i32) {
    %c0_i32 = arith.constant 0 : i32
    %c0_i32_0 = arith.constant 0 : i32
    %c0_i32_1 = arith.constant 0 : i32
    return %c0_i32, %c0_i32_0 : i32, i32
  }
  func.func @transform_5(%arg0: i32, %arg1: i32) -> (i32, i32, i32) {
    %c0_i32 = arith.constant 0 : i32
    %c0_i32_0 = arith.constant 0 : i32
    return %arg0, %c0_i32, %arg1 : i32, i32, i32
  }
}

</mosaic_0001>

<bundles_post_ra>
// kernel: tpu_custom_call.1
= control target key start
LH: loop header
LB: loop body
LE: loop exit
PB: predicated region body
PF: predicated region fallthrough
CT: control target
= control target key end

     0   :  { %10 = vsyncpa [#allocation3], 0  ;;  %s2082_s0 = inlined_call_operand.hbm [shape: f32[2,128,256], index: 0, kind: input, shape index: {}]   ;;  %s2083_s1 = inlined_call_operand.vmem [shape: bf16[256,128], index: 1, kind: input, shape index: {}]   ;;  %s2084_s2 = inlined_call_operand.vmem [shape: f32[128,1], index: 2, kind: input, shape index: {}]   ;;  %s2085_s3 = inlined_call_operand.vmem [shape: bf16[128,128], index: 3, kind: input, shape index: {}]   ;;  %s2086_s4 = inlined_call_operand.vmem [shape: f32[128,1], index: 4, kind: input, shape index: {}]   ;;  %s2087_s5 = inlined_call_operand.hbm [shape: f32[2,128,256], index: 5, kind: output, shape index: {}]  }
   0x1   :  { %12 = vsyncpa [#allocation3 + $0x1], 0 }
   0x2   :  { %13 = vsyncpa [#allocation4], 0 }
   0x3   :  { %15 = vsyncpa [#allocation4 + $0x1], 0  ;;  %s1546_s18 = smov 0   ;;  %s1548_s19 = smov 0  }
   0x4   :  { %s1550_s20 = smov 0   ;;  %s1552_s21 = smov 0  }
   0x5   :  { %s1554_s22 = smov 0   ;;  %s1556_s23 = smov 0  }
   0x6 LB: > { %s1249_s24 = sadd.s32 4294967295, %s1507_s23   ;;  %s1250_s25 = sadd.s32 4294967294, %s1507_s23   ;;  %s1507_s23 = sphi %s1556_s23, %s21_s23   ;;  %s1503_s22 = sphi %s1554_s22, %s2098_s22   ;;  %s1499_s21 = sphi %s1552_s21, %s2097_s21   ;;  %s1495_s20 = sphi %s1550_s20, %s2096_s20   ;;  %s1491_s19 = sphi %s1548_s19, %s2095_s19   ;;  %s1487_s18 = sphi %s1546_s18, %s2094_s18  }
   0x7   : > { %s33_s26 = sadd.s32 1, %s1503_s22  ;;  %s42_s27 = sadd.s32 1, %s1495_s20 }
   0x8   : > { %p35_p0 = scmp.ge.s32.totalorder %s33_s26, 2  ;;  %p49_p1 = scmp.ne.s32.totalorder %s1495_s20, %s1491_s19 }
   0x9   : > { %p50_p2 = scmp.eq.s32.totalorder %s1507_s23, 0  ;;  %p55_p3 = scmp.ne.s32.totalorder %s1491_s19, %s1487_s18 }
   0xa   : > { %s2100_s26 = smov (%p35_p0, %s33_s26), 0  ;;  %p56_p5 = scmp.eq.s32.totalorder %s1249_s24, 0 }
   0xb   : > { %p1587_p4 = por %p50_p2, %p49_p1  ;;  %s37_s29 = ssub.s32 %s1503_s22, %s2100_s26 }
   0xc   : > { %p165_p6 = scmp.eq.s32.totalorder %s1249_s24, 1  ;;  %p40_p7 = scmp.eq.s32.totalorder %s37_s29, 0 }
   0xd   : > { %p1593_p8 = por %p56_p5, %p55_p3  ;;  %p171_p10 = scmp.eq.s32.totalorder %s1250_s25, 1 }
   0xe   : > { %p1597_p9 = por %p165_p6, %p49_p1  ;;  %p1318_p13 = scmp.lt.s32.totalorder %s1507_s23, 2 }
   0xf   : > { %s1602_s7 = scalar_select %p40_p7, %s1495_s20, %s42_s27  }
  0x10   : > { %p1604_p11 = por %p171_p10, %p55_p3  ;;  %s203_s9 = sand.u32 1, %s1495_s20  }
  0x11   : > { %s1253_s10 = sshll.u32 %s203_s9, 8  ;;  %s1288_s11 = sshll.u32 %s1503_s22, 12 }
  0x12   : > { %s215_s14 = scalar_lea.hbm %s2082_s0, %s1288_s11  ;;  %s207_s15 = scalar_lea.vmem [#allocation2], %s1253_s10 }
  0x13   : > { %s216_s16 = sshll.u32 %s207_s15, 4  ;;  %p1617_p0 = pnand %p1318_p13, %p1587_p4  ;;  %s217_s16 = int_to_ptr.vmem [resolvable:$true] %s216_s16 }
  0x14   : > { %p1256_p1 = scmp.ge.s32.totalorder %s1507_s23, 1  ;;  %s204_s24 = scalar_lea.sflag [#allocation3], %s203_s9 }
  0x15   : > { %p1401_p2 = pneg %p1617_p0  ;;  %s1412_s25 = scalar_lea.vmem %s217_s16, 4096 }
  0x16   : > { %p1413_p3 = scmp.ne.s32.totalorder %s217_s16, %s1412_s25  ;;  %s1509_s27 = smov [#allocation2]  }
  0x17   : > { %s1417_s29 = sshll.u32 %s1509_s27, 4  ;;  %s1418_s29 = int_to_ptr.vmem [resolvable:$false] %s1417_s29 }
  0x18   : > { %p1415_p5 = pnand %p1413_p3, %p1401_p2  ;;  %s1419_s10 = scalar_lea.vmem %s1418_s29, 8192 }
  0x19   : > { %p1420_p7 = scmp.lt.s32.totalorder %s217_s16, %s1418_s29  ;;  %p1421_p10 = scmp.lt.s32.totalorder %s1419_s10, %s1412_s25 }
  0x1a   : > { %p1416_p6 = pneg %p1415_p5 }
  0x1b   : > { %p1422_p12 = por %p1421_p10, %p1420_p7 }
  0x1d   : > { %p1423_p4 = pnand %p1422_p12, %p1416_p6 }
  0x1f   : > { %1426 = shalt.err (!%p1423_p4)
}
  0x20   : > { %s1510_s28 = smov 256   ;;  %s1511_s9 = smov 16  }
  0x21   : > { %1313 = dma.hbm_to_vmem [thread:$0]  (!%p1617_p0), %s215_s14, 4096, %s217_s16, %s204_s24, %s1510_s28, %s1510_s28, %s1511_s9  }
  0x22   : > { %p224_p13 = scmp.lt.s32.totalorder %s1507_s23, 3 }
  0x24   : > { %p225_p2 = pnand %p1256_p1, %p224_p13 }
  0x25   : > { %s1630_s11 = sand.u32 (!%p225_p2), 1, %s1491_s19  }
  0x26   : > { %228 = sbr.rel (%p225_p2) target bundleno = 645 (0x285), region = 40  ;;  %s1257_s12 = sshll.u32 (!%p225_p2), %s1630_s11, 8 }
  0x27   : > { %s231_s13 = scalar_lea.sflag (!%p225_p2), [#allocation3], %s1630_s11  ;;  %s1636_s15 = scalar_lea.vmem (!%p225_p2), [#allocation2], %s1257_s12 }
  0x2b   : > { %1478 = dma.done.wait (%p1593_p8), %s231_s13, 4096  }
  0x2c   : > { %1480 = vsyncadd (%p1593_p8), %s231_s13, 4294963200  ;;  %v1512_v0 = vmov 0   ;;  %v293_v1 = vld [vmem:[%s1636_s15 + $0xe8] sm:$0xff]  ;;  %v295_v2 = vld [vmem:[%s1636_s15 + $0xf8] sm:$0xff]  ;;  %s1977_s10 = scalar_lea.vmem [#allocation5], %s1257_s12  ;;  %s1289_s12 = sshll.u32 %s1499_s21, 12 }
  0x2d   : > { %472 = vmatprep.mubr.bf16.mxu0 %v1512_v0  ;;  %1373 = vset.pattern.permute.xlu0 %v1512_v0  ;;  %v292_v3 = vld [vmem:[%s1636_s15 + $0xe0] sm:$0xff]  ;;  %v311_v4 = vpack.c.bf16 %v295_v2, %v293_v1  ;;  %v294_v5 = vld [vmem:[%s1636_s15 + $0xf0] sm:$0xff]  ;;  %v289_v6 = vld [vmem:[%s1636_s15 + $0xc8] sm:$0xff]  ;;  %s1162_s28 = sshll.u32 %s1977_s10, 4  ;;  %s2030_s30 = scalar_lea.hbm %s2087_s5, %s1289_s12  ;;  %s2032_s28 = int_to_ptr.vmem [resolvable:$true] %s1162_s28 }
  0x2e   : > { %1374 = vset.pattern.permute.xlu1 %v1512_v0  ;;  %592 = vmatprep.mubr.bf16.mxu1 %v1512_v0  ;;  %v291_v7 = vld [vmem:[%s1636_s15 + $0xd8] sm:$0xff]  ;;  %v310_v8 = vpack.c.bf16 %v294_v5, %v292_v3  ;;  %v288_v10 = vld [vmem:[%s1636_s15 + $0xc0] sm:$0xff]  ;;  %v290_v11 = vld [vmem:[%s1636_s15 + $0xd0] sm:$0xff]  ;;  %s1147_s21 = scalar_lea.sflag [#allocation4], %s1630_s11  ;;  %s1427_s14 = scalar_lea.vmem %s2032_s28, 4096 }
  0x2f   : > { %v309_v9 = vpack.c.bf16 %v291_v7, %v289_v6  ;;  %v285_v12 = vld [vmem:[%s1636_s15 + $0xa8] sm:$0xff]  ;;  %440 = vmatprep.subr.bf16.mxu0 %v311_v4  ;;  %v287_v13 = vld [vmem:[%s1636_s15 + $0xb8] sm:$0xff]  ;;  %1290 = vmatprep.subr.bf16.mxu1 %v311_v4  ;;  %v308_v14 = vpack.c.bf16 %v290_v11, %v288_v10  ;;  %v284_v16 = vld [vmem:[%s1636_s15 + $0xa0] sm:$0xff]  ;;  %p1428_p8 = scmp.ne.s32.totalorder %s2032_s28, %s1427_s14  ;;  %s1513_s16 = smov [#allocation5]  }
  0x30   : > { %441 = vmatpush1.bf16.msra.mxu0 %v310_v8  ;;  %1298 = vmatpush1.bf16.msra.mxu1 %v310_v8  ;;  %v307_v15 = vpack.c.bf16 %v287_v13, %v285_v12  ;;  %v286_v17 = vld [vmem:[%s1636_s15 + $0xb0] sm:$0xff]  ;;  %v281_v18 = vld [vmem:[%s1636_s15 + $0x88] sm:$0xff]  ;;  %v283_v19 = vld [vmem:[%s1636_s15 + $0x98] sm:$0xff]  ;;  %s1431_s17 = sshll.u32 %s1513_s16, 4  ;;  %s1432_s17 = int_to_ptr.vmem [resolvable:$false] %s1431_s17 }
  0x31   : > { %442 = vmatprep.subr.bf16.mxu0 %v309_v9  ;;  %1291 = vmatprep.subr.bf16.mxu1 %v309_v9  ;;  %v306_v20 = vpack.c.bf16 %v286_v17, %v284_v16  ;;  %v305_v21 = vpack.c.bf16 %v283_v19, %v281_v18  ;;  %v280_v22 = vld [vmem:[%s1636_s15 + $0x80] sm:$0xff]  ;;  %v282_v23 = vld [vmem:[%s1636_s15 + $0x90] sm:$0xff]  ;;  %v277_v24 = vld [vmem:[%s1636_s15 + $0x68] sm:$0xff]  ;;  %p1429_p12 = pnand %p1428_p8, %p1597_p9  ;;  %s1433_s24 = scalar_lea.vmem %s1432_s17, 8192 }
  0x32   : > { %v279_v25 = vld [vmem:[%s1636_s15 + $0x78] sm:$0xff]  ;;  %v276_v26 = vld [vmem:[%s1636_s15 + $0x60] sm:$0xff]  ;;  %v304_v27 = vpack.c.bf16 %v282_v23, %v280_v22  ;;  %v278_v28 = vld [vmem:[%s1636_s15 + $0x70] sm:$0xff]  ;;  %p1434_p1 = scmp.lt.s32.totalorder %s2032_s28, %s1432_s17  ;;  %p1435_p3 = scmp.lt.s32.totalorder %s1433_s24, %s1427_s14 }
  0x33   : > { %v303_v29 = vpack.c.bf16 %v279_v25, %v277_v24  ;;  %v273_v30 = vld [vmem:[%s1636_s15 + $0x48] sm:$0xff]  ;;  %v275_v31 = vld [vmem:[%s1636_s15 + $0x58] sm:$0xff]  ;;  %v272_v32 = vld [vmem:[%s1636_s15 + $0x40] sm:$0xff]  ;;  %v302_v33 = vpack.c.bf16 %v278_v28, %v276_v26  ;;  %p1430_p0 = pneg %p1429_p12 }
  0x34   : > { %443 = vmatpush1.bf16.msra.mxu0 %v308_v14  ;;  %1299 = vmatpush1.bf16.msra.mxu1 %v308_v14  ;;  %v274_v34 = vld [vmem:[%s1636_s15 + $0x50] sm:$0xff]  ;;  %v301_v36 = vpack.c.bf16 %v275_v31, %v273_v30  ;;  %v269_v37 = vld [vmem:[%s1636_s15 + $0x28] sm:$0xff]  ;;  %v645_v38 = vld [vmem:[%s2084_s2 + $0x60] sm:$0xff]  ;;  %p1436_p5 = por %p1435_p3, %p1434_p1 }
  0x35   : > { %444 = vmatprep.subr.bf16.mxu0 %v307_v15  ;;  %1292 = vmatprep.subr.bf16.mxu1 %v307_v15  ;;  %v647_v35 = vld [vmem:[%s2084_s2 + $0x70] sm:$0xff]  ;;  %v271_v39 = vld [vmem:[%s1636_s15 + $0x38] sm:$0xff]  ;;  %v646_v41 = vld [vmem:[%s2084_s2 + $0x68] sm:$0xff]  ;;  %v300_v42 = vpack.c.bf16 %v274_v34, %v272_v32 }
  0x36   : > { %721 = vperm.xlu0 %1373, %v647_v35   ;;  %v648_v40 = vld [vmem:[%s2084_s2 + $0x78] sm:$0xff]  ;;  %711 = vperm.xlu1 %1374, %v645_v38   ;;  %v299_v43 = vpack.c.bf16 %v271_v39, %v269_v37  ;;  %v268_v44 = vld [vmem:[%s1636_s15 + $0x20] sm:$0xff]  ;;  %v270_v45 = vld [vmem:[%s1636_s15 + $0x30] sm:$0xff]  ;;  %p1437_p6 = pnand %p1436_p5, %p1430_p0 }
  0x37   : > { %v265_v46 = vld [vmem:[%s1636_s15 + $0x8] sm:$0xff]  ;;  %v267_v47 = vld [vmem:[%s1636_s15 + $0x18] sm:$0xff]  ;;  %v643_v48 = vld [vmem:[%s2084_s2 + $0x50] sm:$0xff]  ;;  %v298_v50 = vpack.c.bf16 %v270_v45, %v268_v44 }
  0x38   : > { %445 = vmatpush1.bf16.msra.mxu0 %v306_v20  ;;  %1300 = vmatpush1.bf16.msra.mxu1 %v306_v20  ;;  %v644_v49 = vld [vmem:[%s2084_s2 + $0x58] sm:$0xff]  ;;  %v297_v51 = vpack.c.bf16 %v267_v47, %v265_v46  ;;  %v264_v52 = vld [vmem:[%s1636_s15] sm:$0xff]  ;;  %v266_v53 = vld [vmem:[%s1636_s15 + $0x10] sm:$0xff] }
  0x39   : > { %446 = vmatprep.subr.bf16.mxu0 %v305_v21  ;;  %1293 = vmatprep.subr.bf16.mxu1 %v305_v21  ;;  %v641_v54 = vld [vmem:[%s2084_s2 + $0x40] sm:$0xff]  ;;  %v642_v55 = vld [vmem:[%s2084_s2 + $0x48] sm:$0xff]  ;;  %v296_v56 = vpack.c.bf16 %v266_v53, %v264_v52  ;;  %v639_v57 = vld [vmem:[%s2084_s2 + $0x30] sm:$0xff] }
  0x3a   : > { %726 = vperm.xlu0 %1373, %v648_v40   ;;  %716 = vperm.xlu1 %1374, %v646_v41   ;;  %v1375_v58 = vld [vmem:[%s2083_s1] sm:$0xff]   ;;  %v640_v59 = vld [vmem:[%s2084_s2 + $0x38] sm:$0xff]  ;;  %v638_v61 = vld [vmem:[%s2084_s2 + $0x28] sm:$0xff] }
  0x3b   : > { %v637_v60 = vld [vmem:[%s2084_s2 + $0x20] sm:$0xff]  ;;  %v635_v62 = vld [vmem:[%s2084_s2 + $0x10] sm:$0xff]  ;;  %v1376_v63 = vld [vmem:[%s2083_s1 + $0x8] sm:$0xff]  }
  0x3c   : > { %447 = vmatpush1.bf16.msra.mxu0 %v304_v27  ;;  %1301 = vmatpush1.bf16.msra.mxu1 %v304_v27  ;;  %v636_v1 = vld [vmem:[%s2084_s2 + $0x18] sm:$0xff]  ;;  %v633_v2 = vld [vmem:[%s2084_s2] sm:$0xff]  ;;  %v634_v3 = vld [vmem:[%s2084_s2 + $0x8] sm:$0xff] }
  0x3d   : > { %448 = vmatprep.subr.bf16.mxu0 %v303_v29  ;;  %1294 = vmatprep.subr.bf16.mxu1 %v303_v29  ;;  %v986_v4 = vld [vmem:[%s2086_s4] sm:$0xff]  ;;  %v1377_v5 = vld [vmem:[%s2083_s1 + $0x10] sm:$0xff]   ;;  %v987_v6 = vld [vmem:[%s2086_s4 + $0x8] sm:$0xff] }
  0x3e   : > { %701 = vperm.xlu0 %1373, %v643_v48   ;;  %706 = vperm.xlu1 %1374, %v644_v49   ;;  %v988_v7 = vld [vmem:[%s2086_s4 + $0x10] sm:$0xff]  ;;  %v989_v8 = vld [vmem:[%s2086_s4 + $0x18] sm:$0xff]  ;;  %v990_v9 = vld [vmem:[%s2086_s4 + $0x20] sm:$0xff] }
  0x3f   : > { %v1378_v10 = vld [vmem:[%s2083_s1 + $0x18] sm:$0xff]   ;;  %v991_v11 = vld [vmem:[%s2086_s4 + $0x28] sm:$0xff]  ;;  %v992_v12 = vld [vmem:[%s2086_s4 + $0x30] sm:$0xff] }
  0x40   : > { %449 = vmatpush1.bf16.msra.mxu0 %v302_v33  ;;  %1302 = vmatpush1.bf16.msra.mxu1 %v302_v33  ;;  %v993_v13 = vld [vmem:[%s2086_s4 + $0x38] sm:$0xff]  ;;  %v994_v14 = vld [vmem:[%s2086_s4 + $0x40] sm:$0xff]  ;;  %v995_v16 = vld [vmem:[%s2086_s4 + $0x48] sm:$0xff] }
  0x41   : > { %450 = vmatprep.subr.bf16.mxu0 %v301_v36  ;;  %1295 = vmatprep.subr.bf16.mxu1 %v301_v36  ;;  %v1379_v15 = vld [vmem:[%s2083_s1 + $0x20] sm:$0xff]   ;;  %v996_v17 = vld [vmem:[%s2086_s4 + $0x50] sm:$0xff]  ;;  %v997_v18 = vld [vmem:[%s2086_s4 + $0x58] sm:$0xff] }
  0x42   : > { %691 = vperm.xlu0 %1373, %v641_v54   ;;  %696 = vperm.xlu1 %1374, %v642_v55   ;;  %v998_v19 = vld [vmem:[%s2086_s4 + $0x60] sm:$0xff]  ;;  %v1380_v20 = vld [vmem:[%s2083_s1 + $0x28] sm:$0xff]   ;;  %v1000_v22 = vld [vmem:[%s2086_s4 + $0x70] sm:$0xff] }
  0x43   : > { %v999_v21 = vld [vmem:[%s2086_s4 + $0x68] sm:$0xff]  ;;  %v1001_v23 = vld [vmem:[%s2086_s4 + $0x78] sm:$0xff]  ;;  %v1381_v24 = vld [vmem:[%s2083_s1 + $0x30] sm:$0xff]  }
  0x44   : > { %451 = vmatpush1.bf16.msra.mxu0 %v300_v42  ;;  %1303 = vmatpush1.bf16.msra.mxu1 %v300_v42  ;;  %v1382_v25 = vld [vmem:[%s2083_s1 + $0x38] sm:$0xff]   ;;  %v1383_v26 = vld [vmem:[%s2083_s1 + $0x60] sm:$0xff]   ;;  %v1384_v27 = vld [vmem:[%s2083_s1 + $0x68] sm:$0xff]  }
  0x45   : > { %452 = vmatprep.subr.bf16.mxu0 %v299_v43  ;;  %1296 = vmatprep.subr.bf16.mxu1 %v299_v43  ;;  %v1385_v28 = vld [vmem:[%s2083_s1 + $0x70] sm:$0xff]   ;;  %v1386_v29 = vld [vmem:[%s2083_s1 + $0x78] sm:$0xff]   ;;  %v1387_v35 = vld [vmem:[%s2083_s1 + $0x40] sm:$0xff]  }
  0x46   : > { %681 = vperm.xlu0 %1373, %v639_v57   ;;  %686 = vperm.xlu1 %1374, %v640_v59   ;;  %v1389_v38 = vld [vmem:[%s2083_s1 + $0x48] sm:$0xff]   ;;  %v1391_v42 = vld [vmem:[%s2083_s1 + $0x50] sm:$0xff]   ;;  %v1393_v45 = vld [vmem:[%s2083_s1 + $0x58] sm:$0xff]  }
  0x48   : > { %453 = vmatpush1.bf16.msra.mxu0 %v298_v50  ;;  %1304 = vmatpush1.bf16.msra.mxu1 %v298_v50 }
  0x49   : > { %454 = vmatprep.subr.bf16.mxu0 %v297_v51  ;;  %1297 = vmatprep.subr.bf16.mxu1 %v297_v51 }
  0x4a   : > { %671 = vperm.xlu0 %1373, %v637_v60   ;;  %676 = vperm.xlu1 %1374, %v638_v61  }
  0x4c   : > { %455 = vmatpush1.bf16.msra.mxu0 %v296_v56  ;;  %1305 = vmatpush1.bf16.msra.mxu1 %v296_v56 }
  0x4e   : > { %661 = vperm.xlu0 %1373, %v635_v62   ;;  %666 = vperm.xlu1 %1374, %v636_v1  }
  0x4f   : > { %473 = vmatmul.mubr.bf16.vlgmr.msra.gmra.mxu0 %v1375_v58  ;;  %593 = vmatmul.mubr.bf16.vlgmr.msra.gmra.mxu1 %v1383_v26 }
  0x50   : > { %482 = vmatprep.mubr.bf16.mxu0 %v1512_v0  ;;  %602 = vmatprep.mubr.bf16.mxu1 %v1512_v0 }
  0x52   : > { %651 = vperm.xlu0 %1373, %v633_v2   ;;  %656 = vperm.xlu1 %1374, %v634_v3  }
  0x56   : > { %1004 = vperm.xlu0 %1373, %v986_v4   ;;  %1009 = vperm.xlu1 %1374, %v987_v6  }
  0x57   : > { %483 = vmatmul.mubr.bf16.gmra.mxu0 %v1376_v63  ;;  %603 = vmatmul.mubr.bf16.gmra.mxu1 %v1384_v27 }
  0x58   : > { %492 = vmatprep.mubr.bf16.mxu0 %v1512_v0  ;;  %612 = vmatprep.mubr.bf16.mxu1 %v1512_v0 }
  0x5a   : > { %1014 = vperm.xlu0 %1373, %v988_v7   ;;  %1019 = vperm.xlu1 %1374, %v989_v8  }
  0x5e   : > { %1024 = vperm.xlu0 %1373, %v990_v9   ;;  %1029 = vperm.xlu1 %1374, %v991_v11  }
  0x5f   : > { %493 = vmatmul.mubr.bf16.gmra.mxu0 %v1377_v5  ;;  %613 = vmatmul.mubr.bf16.gmra.mxu1 %v1385_v28 }
  0x60   : > { %502 = vmatprep.mubr.bf16.mxu0 %v1512_v0  ;;  %622 = vmatprep.mubr.bf16.mxu1 %v1512_v0 }
  0x62   : > { %1034 = vperm.xlu0 %1373, %v992_v12   ;;  %1039 = vperm.xlu1 %1374, %v993_v13  }
  0x66   : > { %1044 = vperm.xlu0 %1373, %v994_v14   ;;  %1049 = vperm.xlu1 %1374, %v995_v16  }
  0x67   : > { %503 = vmatmul.mubr.bf16.gmra.mxu0 %v1378_v10  ;;  %623 = vmatmul.mubr.bf16.gmra.mxu1 %v1386_v29 }
  0x68   : > { %512 = vmatprep.mubr.bf16.mxu0 %v1512_v0  ;;  %905 = vmatprep.mubr.bf16.mxu1 %v1512_v0 }
  0x6a   : > { %1054 = vperm.xlu0 %1373, %v996_v17   ;;  %1059 = vperm.xlu1 %1374, %v997_v18  }
  0x6e   : > { %1064 = vperm.xlu0 %1373, %v998_v19   ;;  %1069 = vperm.xlu1 %1374, %v999_v21  }
  0x6f   : > { %513 = vmatmul.mubr.bf16.gmra.mxu0 %v1379_v15 }
  0x70   : > { %522 = vmatprep.mubr.bf16.mxu0 %v1512_v0 }
  0x72   : > { %1074 = vperm.xlu0 %1373, %v1000_v22   ;;  %1079 = vperm.xlu1 %1374, %v1001_v23  }
  0x77   : > { %523 = vmatmul.mubr.bf16.gmra.mxu0 %v1380_v20 }
  0x78   : > { %532 = vmatprep.mubr.bf16.mxu0 %v1512_v0 }
  0x7f   : > { %533 = vmatmul.mubr.bf16.gmra.mxu0 %v1381_v24 }
  0x80   : > { %542 = vmatprep.mubr.bf16.mxu0 %v1512_v0 }
  0x87   : > { %543 = vmatmul.mubr.bf16.gmra.mxu0 %v1382_v25 }
  0x88   : > { %552 = vmatprep.mubr.bf16.mxu0 %v1512_v0 }
  0x8f   : > { %553 = vmatmul.mubr.bf16.gmra.mxu0 %v1387_v35 }
  0x90   : > { %562 = vmatprep.mubr.bf16.mxu0 %v1512_v0 }
  0x97   : > { %563 = vmatmul.mubr.bf16.gmra.mxu0 %v1389_v38 }
  0x98   : > { %572 = vmatprep.mubr.bf16.mxu0 %v1512_v0 }
  0x9f   : > { %573 = vmatmul.mubr.bf16.gmra.mxu0 %v1391_v42 }
  0xa0   : > { %582 = vmatprep.mubr.bf16.mxu0 %v1512_v0 }
  0xa7   : > { %583 = vmatmul.mubr.bf16.gmra.mxu0 %v1393_v45 }
  0xb1   : > { %v1821_v30 = vpop.permute.xlu0 %721  ;;  %v1823_v31 = vpop.permute.xlu1 %711 }
  0xb5   : > { %v1826_v32 = vpop.permute.xlu0 %726  ;;  %v1828_v33 = vpop.permute.xlu1 %716 }
  0xb9   : > { %v1830_v34 = vpop.permute.xlu0 %701  ;;  %v1835_v36 = vpop.permute.xlu1 %706 }
  0xbd   : > { %v1838_v37 = vpop.permute.xlu0 %691  ;;  %v1843_v39 = vpop.permute.xlu1 %696 }
  0xc1   : > { %v1846_v40 = vpop.permute.xlu0 %681  ;;  %v1848_v41 = vpop.permute.xlu1 %686 }
  0xc5   : > { %v1853_v43 = vpop.permute.xlu0 %671  ;;  %v1856_v44 = vpop.permute.xlu1 %676 }
  0xc9   : > { %v662_v46 = vpop.permute.xlu0 %661  ;;  %v667_v47 = vpop.permute.xlu1 %666 }
  0xcd   : > { %v652_v48 = vpop.permute.xlu0 %651  ;;  %v657_v51 = vpop.permute.xlu1 %656 }
 0x10f   : > { %v474_v49 = vpop.f32.mrf.mxu0 }
 0x110   : > { %v729_v52 = vadd.f32 %v652_v48, %v474_v49 }
 0x111   : > { %v476_v50 = vpop.f32.mrf.mxu0 }
 0x112   : > { %v730_v54 = vadd.f32 %v652_v48, %v476_v50  ;;  %v761_v57 = vmax.f32 %v729_v52, 0.0 }
 0x113   : > { %v478_v53 = vpop.f32.mrf.mxu0 }
 0x114   : > { %v731_v55 = vadd.f32 %v657_v51, %v478_v53  ;;  %v762_v61 = vmax.f32 %v730_v54, 0.0 }
 0x115   : > { %v480_v56 = vpop.f32.mrf.mxu0 }
 0x116   : > { %v763_v58 = vmax.f32 %v731_v55, 0.0  ;;  %v732_v59 = vadd.f32 %v657_v51, %v480_v56 }
 0x117   : > { %v484_v60 = vpop.f32.mrf.mxu0 }
 0x118   : > { %v1861_v62 = vpack.c.bf16 %v763_v58, %v761_v57  ;;  %v764_v63 = vmax.f32 %v732_v59, 0.0  ;;  %v733_v3 = vadd.f32 %v662_v46, %v484_v60 }
 0x119   : > { %v486_v1 = vpop.f32.mrf.mxu0 }
 0x11a   : > { %v1863_v2 = vpack.c.bf16 %v764_v63, %v762_v61  ;;  %v734_v5 = vadd.f32 %v662_v46, %v486_v1  ;;  %v765_v8 = vmax.f32 %v733_v3, 0.0 }
 0x11b   : > { %v488_v4 = vpop.f32.mrf.mxu0 }
 0x11c   : > { %v735_v6 = vadd.f32 %v667_v47, %v488_v4  ;;  %v766_v12 = vmax.f32 %v734_v5, 0.0 }
 0x11d   : > { %v490_v7 = vpop.f32.mrf.mxu0 }
 0x11e   : > { %v767_v9 = vmax.f32 %v735_v6, 0.0  ;;  %v736_v10 = vadd.f32 %v667_v47, %v490_v7 }
 0x11f   : > { %v1865_v11 = vpop.f32.mrf.mxu0 }
 0x120   : > { %v1867_v13 = vpack.c.bf16 %v767_v9, %v765_v8  ;;  %v768_v14 = vmax.f32 %v736_v10, 0.0 }
 0x121   : > { %v1869_v15 = vpop.f32.mrf.mxu0 }
 0x122   : > { %v1871_v16 = vpack.c.bf16 %v768_v14, %v766_v12 }
 0x123   : > { %v1873_v17 = vpop.f32.mrf.mxu0 }
 0x125   : > { %v1875_v18 = vpop.f32.mrf.mxu0 }
 0x127   : > { %v1877_v19 = vpop.f32.mrf.mxu0 }
 0x129   : > { %v506_v20 = vpop.f32.mrf.mxu0 }
 0x12b   : > { %v508_v21 = vpop.f32.mrf.mxu0 }
 0x12d   : > { %v510_v22 = vpop.f32.mrf.mxu0 }
 0x12f   : > { %v514_v23 = vpop.f32.mrf.mxu0 }
 0x131   : > { %v516_v24 = vpop.f32.mrf.mxu0 }
 0x133   : > { %v518_v25 = vpop.f32.mrf.mxu0 }
 0x135   : > { %v520_v26 = vpop.f32.mrf.mxu0 }
 0x137   : > { %v524_v27 = vpop.f32.mrf.mxu0 }
 0x138   : > { %v749_v10 = vadd.f32 %v1830_v34, %v524_v27 }
 0x139   : > { %v526_v28 = vpop.f32.mrf.mxu0 }
 0x13a   : > { %v750_v4 = vadd.f32 %v1830_v34, %v526_v28  ;;  %v747_v28 = vadd.f32 %v1843_v39, %v518_v25  ;;  %v742_v34 = vadd.f32 %v1846_v40, %v506_v20 }
 0x13b   : > { %v528_v29 = vpop.f32.mrf.mxu0 }
 0x13c   : > { %v751_v6 = vadd.f32 %v1835_v36, %v528_v29  ;;  %v782_v14 = vmax.f32 %v750_v4, 0.0  ;;  %v774_v20 = vmax.f32 %v742_v34, 0.0 }
 0x13d   : > { %v530_v35 = vpop.f32.mrf.mxu0 }
 0x13e   : > { %v752_v59 = vadd.f32 %v1835_v36, %v530_v35  ;;  %v783_v35 = vmax.f32 %v751_v6, 0.0  ;;  %v744_v36 = vadd.f32 %v1848_v41, %v510_v22  ;;  %v741_v22 = vadd.f32 %v1846_v40, %v1877_v19 }
 0x13f   : > { %v534_v38 = vpop.f32.mrf.mxu0 }
 0x140   : > { %v753_v1 = vadd.f32 %v1823_v31, %v534_v38  ;;  %v776_v25 = vmax.f32 %v744_v36, 0.0 }
 0x141   : > { %v536_v42 = vpop.f32.mrf.mxu0 }
 0x142   : > { %v754_v55 = vadd.f32 %v1823_v31, %v536_v42  ;;  %v785_v12 = vmax.f32 %v753_v1, 0.0  ;;  %v746_v31 = vadd.f32 %v1838_v37, %v516_v24  ;;  %v743_v24 = vadd.f32 %v1848_v41, %v508_v21 }
 0x143   : > { %v538_v45 = vpop.f32.mrf.mxu0  ;;  %v739_v41 = vadd.f32 %v1856_v44, %v1873_v17  ;;  %v1398_v17 = vld [vmem:[%s2085_s3 + $0x38] sm:$0xff]  }
 0x144   : > { %v755_v57 = vadd.f32 %v1828_v33, %v538_v45  ;;  %v786_v5 = vmax.f32 %v754_v55, 0.0  ;;  %v781_v45 = vmax.f32 %v749_v10, 0.0  ;;  %v778_v27 = vmax.f32 %v746_v31, 0.0 }
 0x145   : > { %v540_v46 = vpop.f32.mrf.mxu0  ;;  %v775_v21 = vmax.f32 %v743_v24, 0.0  ;;  %v771_v19 = vmax.f32 %v739_v41, 0.0 }
 0x146   : > { %v756_v50 = vadd.f32 %v1828_v33, %v540_v46  ;;  %v787_v7 = vmax.f32 %v755_v57, 0.0  ;;  %v784_v33 = vmax.f32 %v752_v59, 0.0  ;;  %v779_v46 = vmax.f32 %v747_v28, 0.0 }
 0x147   : > { %v544_v47 = vpop.f32.mrf.mxu0 }
 0x148   : > { %v757_v53 = vadd.f32 %v1821_v30, %v544_v47  ;;  %v788_v60 = vmax.f32 %v756_v50, 0.0  ;;  %v821_v38 = vpack.c.bf16 %v787_v7, %v785_v12  ;;  %v820_v42 = vpack.c.bf16 %v784_v33, %v782_v14 }
 0x149   : > { %v546_v48 = vpop.f32.mrf.mxu0  ;;  %v819_v47 = vpack.c.bf16 %v783_v35, %v781_v45 }
 0x14a   : > { %v758_v51 = vadd.f32 %v1821_v30, %v546_v48  ;;  %v789_v3 = vmax.f32 %v757_v53, 0.0  ;;  %v822_v9 = vpack.c.bf16 %v788_v60, %v786_v5 }
 0x14b   : > { %v548_v49 = vpop.f32.mrf.mxu0 }
 0x14c   : > { %v759_v52 = vadd.f32 %v1826_v32, %v548_v49  ;;  %v790_v61 = vmax.f32 %v758_v51, 0.0  ;;  %v816_v51 = vpack.c.bf16 %v776_v25, %v774_v20 }
 0x14d   : > { %v550_v54 = vpop.f32.mrf.mxu0 }
 0x14e   : > { %v760_v56 = vadd.f32 %v1826_v32, %v550_v54  ;;  %v791_v58 = vmax.f32 %v759_v52, 0.0  ;;  %v748_v32 = vadd.f32 %v1843_v39, %v520_v26  ;;  %v745_v26 = vadd.f32 %v1838_v37, %v514_v23 }
 0x14f   : > { %v740_v39 = vadd.f32 %v1856_v44, %v1875_v18  ;;  %v738_v37 = vadd.f32 %v1853_v43, %v1869_v15  ;;  %v737_v18 = vadd.f32 %v1853_v43, %v1865_v11  ;;  %v773_v52 = vmax.f32 %v741_v22, 0.0  ;;  %v1388_v43 = vld [vmem:[%s2085_s3] sm:$0xff]   ;;  %v1390_v44 = vld [vmem:[%s2085_s3 + $0x8] sm:$0xff]   ;;  %v554_v1 = vpop.f32.mrf.mxu0 }
 0x150   : > { %v792_v63 = vmax.f32 %v760_v56, 0.0  ;;  %v823_v8 = vpack.c.bf16 %v791_v58, %v789_v3  ;;  %v780_v29 = vmax.f32 %v748_v32, 0.0  ;;  %v777_v49 = vmax.f32 %v745_v26, 0.0  ;;  %v1395_v11 = vld [vmem:[%s2085_s3 + $0x20] sm:$0xff]   ;;  %v1943_v56 = vpop.f32.mrf.mxu1 }
 0x151   : > { %v772_v50 = vmax.f32 %v740_v39, 0.0  ;;  %v770_v40 = vmax.f32 %v738_v37, 0.0  ;;  %v815_v53 = vpack.c.bf16 %v775_v21, %v773_v52  ;;  %v769_v15 = vmax.f32 %v737_v18, 0.0  ;;  %v556_v4 = vpop.f32.mrf.mxu0 }
 0x152   : > { %v824_v30 = vpack.c.bf16 %v792_v63, %v790_v61  ;;  %v818_v48 = vpack.c.bf16 %v780_v29, %v778_v27  ;;  %v817_v23 = vpack.c.bf16 %v779_v46, %v777_v49  ;;  %v1945_v57 = vpop.f32.mrf.mxu1  ;;  %v1005_v29 = vpop.permute.xlu0 %1004 }
 0x153   : > { %v814_v54 = vpack.c.bf16 %v772_v50, %v770_v40  ;;  %v813_v55 = vpack.c.bf16 %v771_v19, %v769_v15 }
 0x154   : > { %873 = vmatprep.subr.bf16.mxu1 %v824_v30  ;;  %v1947_v58 = vpop.f32.mrf.mxu1  ;;  %v558_v30 = vpop.f32.mrf.mxu0 }
 0x155   : > { %874 = vmatpush1.bf16.msra.mxu1 %v823_v8 }
 0x156   : > { %875 = vmatprep.subr.bf16.mxu1 %v822_v9  ;;  %v1949_v59 = vpop.f32.mrf.mxu1  ;;  %v560_v7 = vpop.f32.mrf.mxu0 }
 0x157   : > { %v1015_v41 = vpop.permute.xlu0 %1014 }
 0x158   : > { %v1951_v60 = vpop.f32.mrf.mxu1  ;;  %v564_v32 = vpop.f32.mrf.mxu0 }
 0x159   : > { %876 = vmatpush1.bf16.msra.mxu1 %v821_v38 }
 0x15a   : > { %877 = vmatprep.subr.bf16.mxu1 %v820_v42  ;;  %v1953_v61 = vpop.f32.mrf.mxu1  ;;  %v566_v9 = vpop.f32.mrf.mxu0 }
 0x15c   : > { %v1955_v63 = vpop.f32.mrf.mxu1  ;;  %v568_v12 = vpop.f32.mrf.mxu0 }
 0x15d   : > { %878 = vmatpush1.bf16.msra.mxu1 %v819_v47  ;;  %v1010_v47 = vpop.permute.xlu1 %1009 }
 0x15e   : > { %879 = vmatprep.subr.bf16.mxu1 %v818_v48  ;;  %v570_v14 = vpop.f32.mrf.mxu0 }
 0x160   : > { %v574_v38 = vpop.f32.mrf.mxu0 }
 0x161   : > { %880 = vmatpush1.bf16.msra.mxu1 %v817_v23  ;;  %v1020_v19 = vpop.permute.xlu1 %1019 }
 0x162   : > { %881 = vmatprep.subr.bf16.mxu1 %v816_v51  ;;  %v576_v27 = vpop.f32.mrf.mxu0 }
 0x164   : > { %v578_v49 = vpop.f32.mrf.mxu0 }
 0x165   : > { %882 = vmatpush1.bf16.msra.mxu1 %v815_v53 }
 0x166   : > { %883 = vmatprep.subr.bf16.mxu1 %v814_v54  ;;  %v580_v18 = vpop.f32.mrf.mxu0 }
 0x169   : > { %884 = vmatpush1.bf16.msra.mxu1 %v813_v55 }
 0x16a   : > { %885 = vmatprep.subr.bf16.mxu1 %v1871_v16  ;;  %v1397_v16 = vld [vmem:[%s2085_s3 + $0x30] sm:$0xff]  }
 0x16d   : > { %886 = vmatpush1.bf16.msra.mxu1 %v1867_v13  ;;  %v1396_v13 = vld [vmem:[%s2085_s3 + $0x28] sm:$0xff]  }
 0x16e   : > { %887 = vmatprep.subr.bf16.mxu1 %v1863_v2  ;;  %v1392_v2 = vld [vmem:[%s2085_s3 + $0x10] sm:$0xff]  }
 0x171   : > { %888 = vmatpush1.bf16.msra.mxu1 %v1861_v62  ;;  %v1394_v62 = vld [vmem:[%s2085_s3 + $0x18] sm:$0xff]  }
 0x174   : > { %906 = vmatmul.mubr.bf16.vlgmr.msra.gmra.mxu1 %v1388_v43  ;;  %v584_v43 = vpop.f32.mrf.mxu0 }
 0x175   : > { %915 = vmatprep.mubr.bf16.mxu1 %v1512_v0 }
 0x17c   : > { %916 = vmatmul.mubr.bf16.gmra.mxu1 %v1390_v44 }
 0x17d   : > { %925 = vmatprep.mubr.bf16.mxu1 %v1512_v0 }
 0x184   : > { %926 = vmatmul.mubr.bf16.gmra.mxu1 %v1392_v2 }
 0x185   : > { %935 = vmatprep.mubr.bf16.mxu1 %v1512_v0 }
 0x18c   : > { %936 = vmatmul.mubr.bf16.gmra.mxu1 %v1394_v62  ;;  %v1025_v62 = vpop.permute.xlu0 %1024 }
 0x18d   : > { %945 = vmatprep.mubr.bf16.mxu1 %v1512_v0 }
 0x194   : > { %946 = vmatmul.mubr.bf16.gmra.mxu1 %v1395_v11 }
 0x195   : > { %955 = vmatprep.mubr.bf16.mxu1 %v1512_v0 }
 0x19c   : > { %956 = vmatmul.mubr.bf16.gmra.mxu1 %v1396_v13 }
 0x19d   : > { %965 = vmatprep.mubr.bf16.mxu1 %v1512_v0 }
 0x1a4   : > { %966 = vmatmul.mubr.bf16.gmra.mxu1 %v1397_v16 }
 0x1a5   : > { %975 = vmatprep.mubr.bf16.mxu1 %v1512_v0  ;;  %v1957_v0 = vpop.f32.mrf.mxu1 }
 0x1a7   : > { %v1959_v3 = vpop.f32.mrf.mxu1 }
 0x1a9   : > { %v1961_v5 = vpop.f32.mrf.mxu1 }
 0x1ab   : > { %v1963_v6 = vpop.f32.mrf.mxu1 }
 0x1ac   : > { %976 = vmatmul.mubr.bf16.gmra.mxu1 %v1398_v17 }
 0x1ad   : > { %v1965_v8 = vpop.f32.mrf.mxu1 }
 0x1af   : > { %v1967_v33 = vpop.f32.mrf.mxu1 }
 0x1b1   : > { %v1969_v10 = vpop.f32.mrf.mxu1 }
 0x1b3   : > { %v1971_v31 = vpop.f32.mrf.mxu1 }
 0x1b5   : > { %v1973_v28 = vpop.f32.mrf.mxu1 }
 0x234   : > { %v907_v35 = vpop.f32.mrf.mxu1 }
 0x235   : > { %v908_v36 = vadd.f32 %v907_v35, %v554_v1  ;;  %v586_v1 = vpop.f32.mrf.mxu0 }
 0x236   : > { %v909_v42 = vpop.f32.mrf.mxu1 }
 0x237   : > { %v1082_v26 = vadd.f32 %v1005_v29, %v908_v36  ;;  %v910_v45 = vadd.f32 %v909_v42, %v556_v4  ;;  %v588_v35 = vpop.f32.mrf.mxu0 }
 0x238   : > { %v911_v34 = vpop.f32.mrf.mxu1 }
 0x239   : > { %1114 = vst [vmem:[%s1977_s10] sm:$0xff] %v1082_v26  ;;  %v1083_v24 = vadd.f32 %v1005_v29, %v910_v45  ;;  %v912_v46 = vadd.f32 %v911_v34, %v558_v30  ;;  %v1035_v29 = vpop.permute.xlu0 %1034 }
 0x23a   : > { %v913_v39 = vpop.f32.mrf.mxu1 }
 0x23b   : > { %1115 = vst [vmem:[%s1977_s10 + $0x8] sm:$0xff] %v1083_v24  ;;  %v1084_v25 = vadd.f32 %v1010_v47, %v912_v46  ;;  %v914_v48 = vadd.f32 %v913_v39, %v560_v7  ;;  %v1030_v7 = vpop.permute.xlu1 %1029 }
 0x23c   : > { %v917_v22 = vpop.f32.mrf.mxu1 }
 0x23d   : > { %1116 = vst [vmem:[%s1977_s10 + $0x10] sm:$0xff] %v1084_v25  ;;  %v1085_v37 = vadd.f32 %v1010_v47, %v914_v48  ;;  %v918_v20 = vadd.f32 %v917_v22, %v564_v32 }
 0x23e   : > { %v919_v21 = vpop.f32.mrf.mxu1 }
 0x23f   : > { %1117 = vst [vmem:[%s1977_s10 + $0x18] sm:$0xff] %v1085_v37  ;;  %v1086_v23 = vadd.f32 %v1015_v41, %v918_v20  ;;  %v920_v50 = vadd.f32 %v919_v21, %v566_v9  ;;  %v1040_v47 = vpop.permute.xlu1 %1039  ;;  %v1045_v20 = vpop.permute.xlu0 %1044 }
 0x240   : > { %v921_v51 = vpop.f32.mrf.mxu1 }
 0x241   : > { %1118 = vst [vmem:[%s1977_s10 + $0x20] sm:$0xff] %v1086_v23  ;;  %v1087_v52 = vadd.f32 %v1015_v41, %v920_v50  ;;  %v922_v40 = vadd.f32 %v921_v51, %v568_v12 }
 0x242   : > { %v923_v53 = vpop.f32.mrf.mxu1 }
 0x243   : > { %1119 = vst [vmem:[%s1977_s10 + $0x28] sm:$0xff] %v1087_v52  ;;  %v1088_v54 = vadd.f32 %v1020_v19, %v922_v40  ;;  %v924_v15 = vadd.f32 %v923_v53, %v570_v14  ;;  %v1050_v52 = vpop.permute.xlu1 %1049 }
 0x244   : > { %v927_v55 = vpop.f32.mrf.mxu1 }
 0x245   : > { %1120 = vst [vmem:[%s1977_s10 + $0x30] sm:$0xff] %v1088_v54  ;;  %v1089_v44 = vadd.f32 %v1020_v19, %v924_v15  ;;  %v928_v2 = vadd.f32 %v927_v55, %v574_v38 }
 0x246   : > { %v929_v11 = vpop.f32.mrf.mxu1 }
 0x247   : > { %1121 = vst [vmem:[%s1977_s10 + $0x38] sm:$0xff] %v1089_v44  ;;  %v1090_v13 = vadd.f32 %v1025_v62, %v928_v2  ;;  %v930_v16 = vadd.f32 %v929_v11, %v576_v27  ;;  %v590_v27 = vpop.f32.mrf.mxu0 }
 0x248   : > { %v931_v17 = vpop.f32.mrf.mxu1 }
 0x249   : > { %1122 = vst [vmem:[%s1977_s10 + $0x40] sm:$0xff] %v1090_v13  ;;  %v1091_v4 = vadd.f32 %v1025_v62, %v930_v16  ;;  %v932_v30 = vadd.f32 %v931_v17, %v578_v49 }
 0x24a   : > { %v933_v32 = vpop.f32.mrf.mxu1 }
 0x24b   : > { %1123 = vst [vmem:[%s1977_s10 + $0x48] sm:$0xff] %v1091_v4  ;;  %v1092_v9 = vadd.f32 %v1030_v7, %v932_v30  ;;  %v934_v12 = vadd.f32 %v933_v32, %v580_v18 }
 0x24c   : > { %v937_v14 = vpop.f32.mrf.mxu1 }
 0x24d   : > { %1124 = vst [vmem:[%s1977_s10 + $0x50] sm:$0xff] %v1092_v9  ;;  %v1093_v38 = vadd.f32 %v1030_v7, %v934_v12  ;;  %v938_v36 = vadd.f32 %v937_v14, %v584_v43 }
 0x24e   : > { %v939_v42 = vpop.f32.mrf.mxu1 }
 0x24f   : > { %1125 = vst [vmem:[%s1977_s10 + $0x58] sm:$0xff] %v1093_v38  ;;  %v1094_v26 = vadd.f32 %v1035_v29, %v938_v36  ;;  %v940_v45 = vadd.f32 %v939_v42, %v586_v1 }
 0x250   : > { %v941_v34 = vpop.f32.mrf.mxu1 }
 0x251   : > { %1126 = vst [vmem:[%s1977_s10 + $0x60] sm:$0xff] %v1094_v26  ;;  %v1095_v24 = vadd.f32 %v1035_v29, %v940_v45  ;;  %v942_v46 = vadd.f32 %v941_v34, %v588_v35 }
 0x252   : > { %v943_v39 = vpop.f32.mrf.mxu1 }
 0x253   : > { %1127 = vst [vmem:[%s1977_s10 + $0x68] sm:$0xff] %v1095_v24  ;;  %v1096_v25 = vadd.f32 %v1040_v47, %v942_v46  ;;  %v944_v48 = vadd.f32 %v943_v39, %v590_v27 }
 0x254   : > { %v947_v22 = vpop.f32.mrf.mxu1 }
 0x255   : > { %1128 = vst [vmem:[%s1977_s10 + $0x70] sm:$0xff] %v1096_v25  ;;  %v1097_v49 = vadd.f32 %v1040_v47, %v944_v48  ;;  %v948_v37 = vadd.f32 %v947_v22, %v1943_v56 }
 0x256   : > { %v949_v41 = vpop.f32.mrf.mxu1 }
 0x257   : > { %1129 = vst [vmem:[%s1977_s10 + $0x78] sm:$0xff] %v1097_v49  ;;  %v1098_v21 = vadd.f32 %v1045_v20, %v948_v37  ;;  %v950_v23 = vadd.f32 %v949_v41, %v1945_v57  ;;  %v1055_v57 = vpop.permute.xlu0 %1054 }
 0x258   : > { %v951_v50 = vpop.f32.mrf.mxu1 }
 0x259   : > { %1130 = vst [vmem:[%s1977_s10 + $0x80] sm:$0xff] %v1098_v21  ;;  %v1099_v51 = vadd.f32 %v1045_v20, %v950_v23  ;;  %v952_v18 = vadd.f32 %v951_v50, %v1947_v58 }
 0x25a   : > { %v953_v40 = vpop.f32.mrf.mxu1 }
 0x25b   : > { %1131 = vst [vmem:[%s1977_s10 + $0x88] sm:$0xff] %v1099_v51  ;;  %v1100_v19 = vadd.f32 %v1050_v52, %v952_v18  ;;  %v954_v56 = vadd.f32 %v953_v40, %v1949_v59  ;;  %v1060_v59 = vpop.permute.xlu1 %1059 }
 0x25c   : > { %v957_v53 = vpop.f32.mrf.mxu1 }
 0x25d   : > { %1132 = vst [vmem:[%s1977_s10 + $0x90] sm:$0xff] %v1100_v19  ;;  %v1101_v54 = vadd.f32 %v1050_v52, %v954_v56  ;;  %v958_v15 = vadd.f32 %v957_v53, %v1951_v60 }
 0x25e   : > { %v959_v55 = vpop.f32.mrf.mxu1 }
 0x25f   : > { %1133 = vst [vmem:[%s1977_s10 + $0x98] sm:$0xff] %v1101_v54  ;;  %v1102_v43 = vadd.f32 %v1055_v57, %v958_v15  ;;  %v960_v58 = vadd.f32 %v959_v55, %v1953_v61  ;;  %v1065_v61 = vpop.permute.xlu0 %1064 }
 0x260   : > { %v961_v44 = vpop.f32.mrf.mxu1 }
 0x261   : > { %1134 = vst [vmem:[%s1977_s10 + $0xa0] sm:$0xff] %v1102_v43  ;;  %v1103_v2 = vadd.f32 %v1055_v57, %v960_v58  ;;  %v962_v62 = vadd.f32 %v961_v44, %v1955_v63 }
 0x262   : > { %v963_v11 = vpop.f32.mrf.mxu1 }
 0x263   : > { %1135 = vst [vmem:[%s1977_s10 + $0xa8] sm:$0xff] %v1103_v2  ;;  %v1104_v13 = vadd.f32 %v1060_v59, %v962_v62  ;;  %v964_v60 = vadd.f32 %v963_v11, %v1957_v0  ;;  %v1070_v0 = vpop.permute.xlu1 %1069  ;;  %v1075_v36 = vpop.permute.xlu0 %1074 }
 0x264   : > { %v967_v16 = vpop.f32.mrf.mxu1 }
 0x265   : > { %1136 = vst [vmem:[%s1977_s10 + $0xb0] sm:$0xff] %v1104_v13  ;;  %v1105_v17 = vadd.f32 %v1060_v59, %v964_v60  ;;  %v968_v1 = vadd.f32 %v967_v16, %v1959_v3 }
 0x266   : > { %v969_v4 = vpop.f32.mrf.mxu1 }
 0x267   : > { %1137 = vst [vmem:[%s1977_s10 + $0xb8] sm:$0xff] %v1105_v17  ;;  %v1106_v30 = vadd.f32 %v1065_v61, %v968_v1  ;;  %v970_v63 = vadd.f32 %v969_v4, %v1961_v5  ;;  %v1080_v34 = vpop.permute.xlu1 %1079 }
 0x268   : > { %v971_v7 = vpop.f32.mrf.mxu1 }
 0x269   : > { %1138 = vst [vmem:[%s1977_s10 + $0xc0] sm:$0xff] %v1106_v30  ;;  %v1107_v32 = vadd.f32 %v1065_v61, %v970_v63  ;;  %v972_v9 = vadd.f32 %v971_v7, %v1963_v6 }
 0x26a   : > { %v973_v12 = vpop.f32.mrf.mxu1 }
 0x26b   : > { %1139 = vst [vmem:[%s1977_s10 + $0xc8] sm:$0xff] %v1107_v32  ;;  %v1108_v14 = vadd.f32 %v1070_v0, %v972_v9  ;;  %v974_v3 = vadd.f32 %v973_v12, %v1965_v8 }
 0x26c   : > { %v977_v35 = vpop.f32.mrf.mxu1 }
 0x26d   : > { %1140 = vst [vmem:[%s1977_s10 + $0xd0] sm:$0xff] %v1108_v14  ;;  %v1109_v38 = vadd.f32 %v1070_v0, %v974_v3  ;;  %v978_v5 = vadd.f32 %v977_v35, %v1967_v33 }
 0x26e   : > { %v979_v29 = vpop.f32.mrf.mxu1 }
 0x26f   : > { %1141 = vst [vmem:[%s1977_s10 + $0xd8] sm:$0xff] %v1109_v38  ;;  %v1110_v6 = vadd.f32 %v1075_v36, %v978_v5  ;;  %v980_v42 = vadd.f32 %v979_v29, %v1969_v10 }
 0x270   : > { %v981_v26 = vpop.f32.mrf.mxu1 }
 0x271   : > { %1142 = vst [vmem:[%s1977_s10 + $0xe0] sm:$0xff] %v1110_v6  ;;  %v1111_v45 = vadd.f32 %v1075_v36, %v980_v42  ;;  %v982_v8 = vadd.f32 %v981_v26, %v1971_v31 }
 0x272   : > { %v983_v27 = vpop.f32.mrf.mxu1 }
 0x273   : > { %1143 = vst [vmem:[%s1977_s10 + $0xe8] sm:$0xff] %v1111_v45  ;;  %v1112_v33 = vadd.f32 %v1080_v34, %v982_v8  ;;  %v984_v24 = vadd.f32 %v983_v27, %v1973_v28 }
 0x275   : > { %1144 = vst [vmem:[%s1977_s10 + $0xf0] sm:$0xff] %v1112_v33  ;;  %v1113_v10 = vadd.f32 %v1080_v34, %v984_v24 }
 0x277   : > { %1145 = vst [vmem:[%s1977_s10 + $0xf8] sm:$0xff] %v1113_v10 }
 0x278   : > { %1440 = shalt.err (!%p1437_p6)
}
 0x279   : > { %s1441_s25 = scalar_lea.hbm %s2030_s30, 4096  ;;  %s1445_s29 = scalar_lea.hbm %s2087_s5, 8192 }
 0x27a   : > { %p1442_p7 = scmp.ne.s32.totalorder %s2030_s30, %s1441_s25  ;;  %p1446_p13 = scmp.lt.s32.totalorder %s2030_s30, %s2087_s5 }
 0x27b   : > { %p1447_p2 = scmp.lt.s32.totalorder %s1445_s29, %s1441_s25 }
 0x27c   : > { %p1443_p10 = pnand %p1442_p7, %p1597_p9 }
 0x27d   : > { %p1448_p8 = por %p1447_p2, %p1446_p13 }
 0x27e   : > { %p1444_p4 = pneg %p1443_p10 }
 0x280   : > { %p1449_p12 = pnand %p1448_p8, %p1444_p4 }
 0x282   : > { %1452 = shalt.err (!%p1449_p12)
}
 0x283   : > { %s1514_s9 = smov 256   ;;  %s1515_s13 = smov 16  }
 0x284   : > { %1308 = dma.vmem_to_hbm [thread:$0]  (%p1597_p9), %s2032_s28, 4096, %s2030_s30, %s1147_s21, %s1514_s9, %s1514_s9, %s1515_s13  }
 0x285 PF: > { %s1177_s14 = sand.u32 1, %s1487_s18   ;;  %p2093_p0 = scmp.ge.s32.totalorder %s1507_s23, 2 }
 0x286   : > { %s1178_s16 = scalar_lea.sflag [#allocation4], %s1177_s14 }
 0x287   : > { %p1315_p1 = pnand %p2093_p0, %p1604_p11 }
 0x289   : > { %p1316_p3 = pneg %p1315_p1 }
 0x28b   : > { %1482 = dma.done.wait (%p1316_p3), %s1178_s16, 4096  }
 0x28c   : > { %1484 = vsyncadd (%p1316_p3), %s1178_s16, 4294963200  ;;  %s21_s23 = sadd.s32 1, %s1507_s23   ;;  %s2094_s18 = smov %s1491_s19 }
 0x28d   : > { %p18_p5 = scmp.ge.s32.totalorder %s21_s23, 4   ;;  %s2095_s19 = smov %s1495_s20 }
 0x28e   : > { %s2096_s20 = smov %s1602_s7  ;;  %s2097_s21 = smov %s1503_s22 }
 0x28f   : > { %s2098_s22 = smov %s2100_s26  ;;  %20 = sbr.rel (!%p18_p5) target bundleno = 6 (0x6), region = 85 }
 0x294   :  { %1183 = vsyncpa [#allocation3], 1 }
 0x295   :  { %1185 = vsyncpa [#allocation3 + $0x1], 1 }
 0x296   :  { %1186 = vsyncpa [#allocation4], 1 }
 0x297   :  { %1188 = vsyncpa [#allocation4 + $0x1], 1 }

</bundles_post_ra>
